<compile_context>
chip_gen: v7x
topology: tpu7x:2x2x1
jax: 0.10.0
libtpu: 0.0.40
codegen_flags: <defaults>
</compile_context>

<pallas_src>
import math

import numpy as np
import jax
import jax.numpy as jnp
from jax import lax
from jax.experimental import pallas as pl
from jax.experimental.pallas import tpu as pltpu

_BN_EPS = 1e-5
_SQRT_HALF = np.float32(np.sqrt(np.float32(0.5)))  # matches torch.sqrt(FloatTensor([0.5]))


# ----------------------------- fused block kernel ----------------------------
def _make_glu_block_kernel(n_layers: int, first: bool, vbs: int, d_out: int):
    """Kernel over one row tile: all n_glu layers, per-virtual-batch ghost BN."""

    def kernel(x_ref, *rest):
        wv_refs = rest[:n_layers]                 # per-layer (d_in_l, d_out) value weights
        wg_refs = rest[n_layers:2 * n_layers]     # per-layer (d_in_l, d_out) gate  weights
        gb_ref = rest[2 * n_layers]               # (4*n_layers, d_out): gv, bv, gg, bg per layer
        o_ref = rest[2 * n_layers + 1]

        x = x_ref[...].astype(jnp.float32)        # (rows, d_in)
        rows = x.shape[0]
        n_vb = rows // vbs

        def gbn(h, gamma, beta):
            # Single-pass ghost BatchNorm (biased var = E[h^2] - mean^2, train mode)
            # with gamma/beta folded into one per-column scale/shift: hn = h*a + b.
            h3 = h.reshape(n_vb, vbs, d_out)
            mean = jnp.mean(h3, axis=1, keepdims=True)          # (n_vb, 1, d_out)
            ex2 = jnp.mean(h3 * h3, axis=1, keepdims=True)
            var = ex2 - mean * mean
            a = gamma * lax.rsqrt(var + _BN_EPS)                # small; rsqrt on EUP
            b = beta - a * mean
            return (h3 * a + b).reshape(rows, d_out)

        def one_layer(h_in, l, residual):
            wv = wv_refs[l][...].astype(jnp.float32)            # (d_in_l, d_out)
            wg = wg_refs[l][...].astype(jnp.float32)
            gb = gb_ref[4 * l:4 * l + 4, :].astype(jnp.float32)  # (4, d_out)
            g_v = gb[0:1, :].reshape(1, 1, d_out)
            b_v = gb[1:2, :].reshape(1, 1, d_out)
            g_g = gb[2:3, :].reshape(1, 1, d_out)
            b_g = gb[3:4, :].reshape(1, 1, d_out)

            # fc (no bias): value and gate halves as two MXU matmuls (f32 accumulate).
            hv = jnp.dot(h_in, wv, preferred_element_type=jnp.float32)  # (rows, d_out)
            hg = jnp.dot(h_in, wg, preferred_element_type=jnp.float32)

            # GLU: bn(value) * sigmoid(bn(gate)); sigmoid hits the EUP.
            y = gbn(hv, g_v, b_v) * jax.nn.sigmoid(gbn(hg, g_g, b_g))

            if residual:
                return (h_in + y) * _SQRT_HALF
            return y

        start = 0
        if first:
            x = one_layer(x, 0, residual=False)
            start = 1
        for l in range(start, n_layers):
            x = one_layer(x, l, residual=True)

        o_ref[...] = x.astype(o_ref.dtype)

    return kernel


# --------------------------------- wrapper -----------------------------------
def _vmem_capacity_bytes() -> int:
    """Physical VMEM per TensorCore; conservative fallback if the query fails."""
    try:
        return int(pltpu.get_tpu_info().vmem_capacity_bytes)
    except Exception:
        return 64 * 2**20  # v7x per-TC size (smallest of current gens)


def _pick_rows_per_tile(B: int, chunk: int, bytes_per_row: int,
                        act_budget_bytes: int) -> int:
    """Rows per grid step: a multiple of `chunk` that divides B.

    Picks the largest divisor of the chunk count whose activation working set
    fits `act_budget_bytes`, then prefers an even grid (so both of v7x's
    TensorCores get work under dimension_semantics=('parallel',)) — but only if
    that keeps the tile within 2x of the unconstrained best, so prime chunk
    counts never collapse to one-virtual-batch tiles.
    """
    n_chunks_total = B // chunk
    bytes_per_chunk = max(1, bytes_per_row * chunk)
    max_chunks = max(1, min(n_chunks_total, act_budget_bytes // bytes_per_chunk))

    divisors = [d for d in range(1, n_chunks_total + 1) if n_chunks_total % d == 0]
    feasible = [d for d in divisors if d <= max_chunks] or [1]
    best = max(feasible)

    if (n_chunks_total // best) % 2 != 0:
        even = [d for d in feasible
                if (n_chunks_total // d) % 2 == 0 and 2 * d >= best]
        if even:
            best = max(even)
    return best * chunk


def glu_block(X, params, *, first: bool, virtual_batch_size: int,
              storage_dtype=None):
    """Fused GLU_Block forward: one pallas_call for all n_glu layers.

    params: list of (Wt, gamma, beta) per layer with
            Wt: (d_in_l, 2*d_out), gamma/beta: (2*d_out,).
    storage_dtype: optional dtype (e.g. jnp.bfloat16) for streamed X / weights /
            output; all compute and BN statistics stay in float32.
    """
    B, d_in = X.shape
    n_layers = len(params)
    assert n_layers >= 1
    d_out = params[0][0].shape[1] // 2
    if not first:
        assert d_in == d_out, "first=False requires input_dim == output_dim"

    # torch.chunk(ceil(B/vbs)) semantics -> chunk size ceil(B / n_chunks)
    n_chunks = math.ceil(B / virtual_batch_size)
    chunk = math.ceil(B / n_chunks)
    # TODO(synk): ragged last virtual batch (B % chunk != 0) not supported here.
    assert B % chunk == 0, "batch must split into equal virtual batches"
    assert chunk % 8 == 0 or chunk == B, "virtual batch must respect (8,128) tiling"

    if storage_dtype is None:
        storage_dtype = X.dtype
    storage_dtype = np.dtype(storage_dtype)
    itemsize = storage_dtype.itemsize

    Xs = X.astype(storage_dtype)
    # Pre-split each weight into value / gate halves -> no lane slicing in-kernel.
    wvs = [jnp.asarray(p[0])[:, :d_out].astype(storage_dtype) for p in params]
    wgs = [jnp.asarray(p[0])[:, d_out:].astype(storage_dtype) for p in params]

    gb_rows = []
    for (_, g, b) in params:
        g = jnp.asarray(g).reshape(-1).astype(jnp.float32)
        b = jnp.asarray(b).reshape(-1).astype(jnp.float32)
        gb_rows += [g[:d_out], b[:d_out], g[d_out:], b[d_out:]]
    gb_all = jnp.stack(gb_rows, axis=0)  # (4*n_layers, d_out)

    # --- VMEM-derived tile sizing -------------------------------------------
    vmem_cap = _vmem_capacity_bytes()
    # Per-row bytes: streamed x/out blocks (double-buffered, storage dtype) plus
    # a generous allowance for the unrolled layers' f32 intermediates.
    bytes_per_row = 2 * (d_in + d_out) * itemsize + 4 * (d_in + 8 * d_out)
    act_budget = min(vmem_cap // 4, 24 * 2**20)
    rows_per_tile = _pick_rows_per_tile(B, chunk, bytes_per_row, act_budget)
    grid = (B // rows_per_tile,)

    kernel = _make_glu_block_kernel(n_layers, first, chunk, d_out)

    in_specs = [pl.BlockSpec((rows_per_tile, d_in), lambda i: (i, 0))]
    for w in wvs + wgs:  # resident weights, constant block index -> DMA'd once
        in_specs.append(pl.BlockSpec(w.shape, lambda i: (0, 0)))
    in_specs.append(pl.BlockSpec(gb_all.shape, lambda i: (0, 0)))

    # VMEM estimate: x/out double-buffered + weights (default double-buffered)
    # + padded gamma/beta slab + in-kernel f32 temporaries.
    w_bytes = sum(int(np.prod(w.shape)) for w in wvs + wgs) * itemsize
    est = (2 * rows_per_tile * (d_in + d_out) * itemsize
           + 2 * w_bytes
           + 2 * 8 * max(d_out, 128) * 4
           + 4 * rows_per_tile * (d_in + 8 * d_out))
    # Cap well below physical VMEM: 48 MiB on v7x (64 MiB/TC), 96 MiB on v5e/v6e.
    cap = min(int(0.75 * vmem_cap), 96 * 2**20)
    vmem_limit = int(min(cap, max(2 * est, 32 * 2**20)))

    return pl.pallas_call(
        kernel,
        out_shape=jax.ShapeDtypeStruct((B, d_out), storage_dtype),
        grid_spec=pltpu.PrefetchScalarGridSpec(
            num_scalar_prefetch=0,
            grid=grid,
            in_specs=in_specs,
            out_specs=pl.BlockSpec((rows_per_tile, d_out), lambda i: (i, 0)),
        ),
        compiler_params=pltpu.CompilerParams(
            dimension_semantics=("parallel",),
            vmem_limit_bytes=vmem_limit,
        ),
    )(Xs, *wvs, *wgs, gb_all)


# ------------------------------ parameter init -------------------------------
def init_glu_block_params(key, input_dim, output_dim, n_glu):
    """Deterministic params matching GLU_Block.__init__ shapes.

    Per layer i: fc weight W of shape (2*d_out, d_in) initialized xavier_normal
    with gain sqrt((d_in + 2*d_out)/sqrt(d_in)); BN gamma=1, beta=0.
    Stored as (Wt, gamma, beta) with Wt = W.T of shape (d_in, 2*d_out).
    """
    dims = [input_dim] + [output_dim] * n_glu
    params = []
    for i in range(n_glu):
        d_in, d_out = dims[i], dims[i + 1]
        key, sub = jax.random.split(key)
        gain = np.sqrt((d_in + 2 * d_out) / np.sqrt(d_in))
        std = gain * np.sqrt(2.0 / (d_in + 2 * d_out))          # xavier_normal_
        w = std * jax.random.normal(sub, (2 * d_out, d_in), dtype=jnp.float32)
        wt = w.T                                                # (d_in, 2*d_out)
        gamma = jnp.ones((2 * d_out,), jnp.float32)
        beta = jnp.zeros((2 * d_out,), jnp.float32)
        params.append((wt, gamma, beta))
    return params


# ---------------------------- pure-JAX reference -----------------------------
def _ref_layer(x, wt, gamma, beta, residual, vbs):
    B = x.shape[0]
    n_chunks = math.ceil(B / vbs)
    chunk = math.ceil(B / n_chunks)
    d_out = wt.shape[1] // 2
    outs = []
    for c in range(math.ceil(B / chunk)):
        xc = x[c * chunk:(c + 1) * chunk]
        h = xc @ wt
        m = h.mean(0, keepdims=True)
        v = ((h - m) ** 2).mean(0, keepdims=True)
        hn = (h - m) / jnp.sqrt(v + _BN_EPS) * gamma + beta
        y = hn[:, :d_out] * jax.nn.sigmoid(hn[:, d_out:])
        if residual:
            y = (xc + y) * _SQRT_HALF
        outs.append(y)
    return jnp.concatenate(outs, 0)


def _ref_block(X, params, first, vbs):
    x = X
    if first:
        x = _ref_layer(x, *params[0], residual=False, vbs=vbs)
        rest = params[1:]
    else:
        rest = params
    for p in rest:
        x = _ref_layer(x, *p, residual=True, vbs=vbs)
    return x


if __name__ == "__main__":
    key = jax.random.PRNGKey(0)
    k1, k2, k3, k4, k5, k6 = jax.random.split(key, 6)

    # Config A: first=False (identity first layer), input_dim == output_dim, f32.
    B, d_model, n_glu, vbs = 16, 32, 2, 8
    X = jax.random.normal(k1, (B, d_model), dtype=jnp.float32)
    params = init_glu_block_params(k2, d_model, d_model, n_glu)
    out = jax.block_until_ready(
        glu_block(X, params, first=False, virtual_batch_size=vbs))
    ref = _ref_block(X, params, first=False, vbs=vbs)
    np.testing.assert_allclose(np.asarray(out), np.asarray(ref), rtol=1e-4, atol=1e-4)

    # Config B: first=True with input_dim != output_dim, f32.
    d_in2, d_out2 = 48, 32
    X2 = jax.random.normal(k3, (B, d_in2), dtype=jnp.float32)
    params2 = init_glu_block_params(k4, d_in2, d_out2, n_glu)
    out2 = jax.block_until_ready(
        glu_block(X2, params2, first=True, virtual_batch_size=vbs))
    ref2 = _ref_block(X2, params2, first=True, vbs=vbs)
    np.testing.assert_allclose(np.asarray(out2), np.asarray(ref2), rtol=1e-4, atol=1e-4)

    # Config C: bf16 storage path (multi-chunk batch, exercises even-grid tiling).
    B3, d3, vbs3 = 256, 32, 64
    X3 = jax.random.normal(k5, (B3, d3), dtype=jnp.float32)
    params3 = init_glu_block_params(k6, d3, d3, 2)
    out3 = jax.block_until_ready(
        glu_block(X3, params3, first=False, virtual_batch_size=vbs3,
                  storage_dtype=jnp.bfloat16))
    X3r = X3.astype(jnp.bfloat16).astype(jnp.float32)
    params3r = [(wt.astype(jnp.bfloat16).astype(jnp.float32), g, b)
                for (wt, g, b) in params3]
    ref3 = _ref_block(X3r, params3r, first=False, vbs=vbs3)
    np.testing.assert_allclose(np.asarray(out3.astype(jnp.float32)),
                               np.asarray(ref3), rtol=2e-2, atol=2e-2)

    print("KERNEL_OK")
</pallas_src>

<mosaic_0001>
module attributes {stable_mosaic.version = 11 : i64} {
  func.func @kernel(%arg0: i32, %arg1: memref<8x32xf32, #tpu.memory_space<vmem>>, %arg2: memref<32x32xf32, #tpu.memory_space<vmem>>, %arg3: memref<32x32xf32, #tpu.memory_space<vmem>>, %arg4: memref<32x32xf32, #tpu.memory_space<vmem>>, %arg5: memref<32x32xf32, #tpu.memory_space<vmem>>, %arg6: memref<8x32xf32, #tpu.memory_space<vmem>>, %arg7: memref<8x32xf32, #tpu.memory_space<vmem>>) attributes {dimension_semantics = [#tpu.dimension_semantics<parallel>], iteration_bounds = array<i64: 2>, scalar_prefetch = 0 : i64, scratch_operands = 0 : i64, tpu.core_type = #tpu.core_type<tc>, window_params = [{transform_indices = @transform_0, window_bounds = array<i64: 8, 32>}, {pipeline_mode = #tpu.pipeline_mode<synchronous>, transform_indices = @transform_1, window_bounds = array<i64: 32, 32>}, {pipeline_mode = #tpu.pipeline_mode<synchronous>, transform_indices = @transform_2, window_bounds = array<i64: 32, 32>}, {pipeline_mode = #tpu.pipeline_mode<synchronous>, transform_indices = @transform_3, window_bounds = array<i64: 32, 32>}, {pipeline_mode = #tpu.pipeline_mode<synchronous>, transform_indices = @transform_4, window_bounds = array<i64: 32, 32>}, {pipeline_mode = #tpu.pipeline_mode<synchronous>, transform_indices = @transform_5, window_bounds = array<i64: 8, 32>}, {transform_indices = @transform_6, window_bounds = array<i64: 8, 32>}]} {
    %c0 = arith.constant 0 : index
    %c0_0 = arith.constant 0 : index
    %0 = vector.load %arg1[%c0, %c0_0] : memref<8x32xf32, #tpu.memory_space<vmem>>, vector<8x32xf32>
    %c0_1 = arith.constant 0 : index
    %c0_2 = arith.constant 0 : index
    %1 = vector.load %arg2[%c0_1, %c0_2] : memref<32x32xf32, #tpu.memory_space<vmem>>, vector<32x32xf32>
    %c0_3 = arith.constant 0 : index
    %c0_4 = arith.constant 0 : index
    %2 = vector.load %arg4[%c0_3, %c0_4] : memref<32x32xf32, #tpu.memory_space<vmem>>, vector<32x32xf32>
    %c0_5 = arith.constant 0 : index
    %c0_6 = arith.constant 0 : index
    %3 = vector.load %arg6[%c0_5, %c0_6] : memref<8x32xf32, #tpu.memory_space<vmem>>, vector<4x32xf32>
    %4 = vector.extract_strided_slice %3 {offsets = [0, 0], sizes = [1, 32], strides = [1, 1]} : vector<4x32xf32> to vector<1x32xf32>
    %5 = vector.shape_cast %4 : vector<1x32xf32> to vector<1x1x32xf32>
    %6 = vector.extract_strided_slice %3 {offsets = [1, 0], sizes = [1, 32], strides = [1, 1]} : vector<4x32xf32> to vector<1x32xf32>
    %7 = vector.shape_cast %6 : vector<1x32xf32> to vector<1x1x32xf32>
    %8 = vector.extract_strided_slice %3 {offsets = [2, 0], sizes = [1, 32], strides = [1, 1]} : vector<4x32xf32> to vector<1x32xf32>
    %9 = vector.shape_cast %8 : vector<1x32xf32> to vector<1x1x32xf32>
    %10 = vector.extract_strided_slice %3 {offsets = [3, 0], sizes = [1, 32], strides = [1, 1]} : vector<4x32xf32> to vector<1x32xf32>
    %11 = vector.shape_cast %10 : vector<1x32xf32> to vector<1x1x32xf32>
    %cst = arith.constant dense<0.000000e+00> : vector<8x32xf32>
    %12 = tpu.matmul %0, %1, %cst {dimension_numbers = #tpu.dot_dimension_numbers<[1], [0], [0], [1], [0, 0, 1, 1], [], []>} : vector<8x32xf32>, vector<32x32xf32>, vector<8x32xf32> -> vector<8x32xf32>
    %cst_7 = arith.constant dense<0.000000e+00> : vector<8x32xf32>
    %13 = tpu.matmul %0, %2, %cst_7 {dimension_numbers = #tpu.dot_dimension_numbers<[1], [0], [0], [1], [0, 0, 1, 1], [], []>} : vector<8x32xf32>, vector<32x32xf32>, vector<8x32xf32> -> vector<8x32xf32>
    %14 = vector.shape_cast %12 : vector<8x32xf32> to vector<1x8x32xf32>
    %cst_8 = arith.constant dense<0.000000e+00> : vector<1x32xf32>
    %15 = vector.multi_reduction <add>, %14, %cst_8 [1] : vector<1x8x32xf32> to vector<1x32xf32>
    %16 = vector.shape_cast %15 : vector<1x32xf32> to vector<1x1x32xf32>
    %cst_9 = arith.constant 8.000000e+00 : f32
    %17 = vector.broadcast %cst_9 : f32 to vector<1x1x32xf32>
    %18 = arith.divf %16, %17 : vector<1x1x32xf32>
    %19 = arith.mulf %14, %14 : vector<1x8x32xf32>
    %cst_10 = arith.constant dense<0.000000e+00> : vector<1x32xf32>
    %20 = vector.multi_reduction <add>, %19, %cst_10 [1] : vector<1x8x32xf32> to vector<1x32xf32>
    %21 = vector.shape_cast %20 : vector<1x32xf32> to vector<1x1x32xf32>
    %cst_11 = arith.constant 8.000000e+00 : f32
    %22 = vector.broadcast %cst_11 : f32 to vector<1x1x32xf32>
    %23 = arith.divf %21, %22 : vector<1x1x32xf32>
    %24 = arith.mulf %18, %18 : vector<1x1x32xf32>
    %25 = arith.subf %23, %24 : vector<1x1x32xf32>
    %cst_12 = arith.constant 9.99999974E-6 : f32
    %26 = vector.broadcast %cst_12 : f32 to vector<1x1x32xf32>
    %27 = arith.addf %25, %26 : vector<1x1x32xf32>
    %28 = math.rsqrt %27 : vector<1x1x32xf32>
    %29 = arith.mulf %5, %28 : vector<1x1x32xf32>
    %30 = arith.mulf %29, %18 : vector<1x1x32xf32>
    %31 = arith.subf %7, %30 : vector<1x1x32xf32>
    %32 = vector.broadcast %29 : vector<1x1x32xf32> to vector<1x8x32xf32>
    %33 = arith.mulf %14, %32 : vector<1x8x32xf32>
    %34 = vector.broadcast %31 : vector<1x1x32xf32> to vector<1x8x32xf32>
    %35 = arith.addf %33, %34 : vector<1x8x32xf32>
    %36 = vector.shape_cast %35 : vector<1x8x32xf32> to vector<8x32xf32>
    %37 = vector.shape_cast %13 : vector<8x32xf32> to vector<1x8x32xf32>
    %cst_13 = arith.constant dense<0.000000e+00> : vector<1x32xf32>
    %38 = vector.multi_reduction <add>, %37, %cst_13 [1] : vector<1x8x32xf32> to vector<1x32xf32>
    %39 = vector.shape_cast %38 : vector<1x32xf32> to vector<1x1x32xf32>
    %cst_14 = arith.constant 8.000000e+00 : f32
    %40 = vector.broadcast %cst_14 : f32 to vector<1x1x32xf32>
    %41 = arith.divf %39, %40 : vector<1x1x32xf32>
    %42 = arith.mulf %37, %37 : vector<1x8x32xf32>
    %cst_15 = arith.constant dense<0.000000e+00> : vector<1x32xf32>
    %43 = vector.multi_reduction <add>, %42, %cst_15 [1] : vector<1x8x32xf32> to vector<1x32xf32>
    %44 = vector.shape_cast %43 : vector<1x32xf32> to vector<1x1x32xf32>
    %cst_16 = arith.constant 8.000000e+00 : f32
    %45 = vector.broadcast %cst_16 : f32 to vector<1x1x32xf32>
    %46 = arith.divf %44, %45 : vector<1x1x32xf32>
    %47 = arith.mulf %41, %41 : vector<1x1x32xf32>
    %48 = arith.subf %46, %47 : vector<1x1x32xf32>
    %cst_17 = arith.constant 9.99999974E-6 : f32
    %49 = vector.broadcast %cst_17 : f32 to vector<1x1x32xf32>
    %50 = arith.addf %48, %49 : vector<1x1x32xf32>
    %51 = math.rsqrt %50 : vector<1x1x32xf32>
    %52 = arith.mulf %9, %51 : vector<1x1x32xf32>
    %53 = arith.mulf %52, %41 : vector<1x1x32xf32>
    %54 = arith.subf %11, %53 : vector<1x1x32xf32>
    %55 = vector.broadcast %52 : vector<1x1x32xf32> to vector<1x8x32xf32>
    %56 = arith.mulf %37, %55 : vector<1x8x32xf32>
    %57 = vector.broadcast %54 : vector<1x1x32xf32> to vector<1x8x32xf32>
    %58 = arith.addf %56, %57 : vector<1x8x32xf32>
    %59 = vector.shape_cast %58 : vector<1x8x32xf32> to vector<8x32xf32>
    %60 = arith.negf %59 : vector<8x32xf32>
    %61 = math.exp %60 : vector<8x32xf32>
    %cst_18 = arith.constant 1.000000e+00 : f32
    %62 = vector.broadcast %cst_18 : f32 to vector<8x32xf32>
    %63 = arith.addf %62, %61 : vector<8x32xf32>
    %64 = arith.divf %62, %63 : vector<8x32xf32>
    %65 = arith.mulf %36, %64 : vector<8x32xf32>
    %66 = arith.addf %0, %65 : vector<8x32xf32>
    %cst_19 = arith.constant 0.707106769 : f32
    %67 = vector.broadcast %cst_19 : f32 to vector<8x32xf32>
    %68 = arith.mulf %66, %67 : vector<8x32xf32>
    %c0_20 = arith.constant 0 : index
    %c0_21 = arith.constant 0 : index
    %69 = vector.load %arg3[%c0_20, %c0_21] : memref<32x32xf32, #tpu.memory_space<vmem>>, vector<32x32xf32>
    %c0_22 = arith.constant 0 : index
    %c0_23 = arith.constant 0 : index
    %70 = vector.load %arg5[%c0_22, %c0_23] : memref<32x32xf32, #tpu.memory_space<vmem>>, vector<32x32xf32>
    %c4 = arith.constant 4 : index
    %c0_24 = arith.constant 0 : index
    %71 = vector.load %arg6[%c4, %c0_24] : memref<8x32xf32, #tpu.memory_space<vmem>>, vector<4x32xf32>
    %72 = vector.extract_strided_slice %71 {offsets = [0, 0], sizes = [1, 32], strides = [1, 1]} : vector<4x32xf32> to vector<1x32xf32>
    %73 = vector.shape_cast %72 : vector<1x32xf32> to vector<1x1x32xf32>
    %74 = vector.extract_strided_slice %71 {offsets = [1, 0], sizes = [1, 32], strides = [1, 1]} : vector<4x32xf32> to vector<1x32xf32>
    %75 = vector.shape_cast %74 : vector<1x32xf32> to vector<1x1x32xf32>
    %76 = vector.extract_strided_slice %71 {offsets = [2, 0], sizes = [1, 32], strides = [1, 1]} : vector<4x32xf32> to vector<1x32xf32>
    %77 = vector.shape_cast %76 : vector<1x32xf32> to vector<1x1x32xf32>
    %78 = vector.extract_strided_slice %71 {offsets = [3, 0], sizes = [1, 32], strides = [1, 1]} : vector<4x32xf32> to vector<1x32xf32>
    %79 = vector.shape_cast %78 : vector<1x32xf32> to vector<1x1x32xf32>
    %cst_25 = arith.constant dense<0.000000e+00> : vector<8x32xf32>
    %80 = tpu.matmul %68, %69, %cst_25 {dimension_numbers = #tpu.dot_dimension_numbers<[1], [0], [0], [1], [0, 0, 1, 1], [], []>} : vector<8x32xf32>, vector<32x32xf32>, vector<8x32xf32> -> vector<8x32xf32>
    %cst_26 = arith.constant dense<0.000000e+00> : vector<8x32xf32>
    %81 = tpu.matmul %68, %70, %cst_26 {dimension_numbers = #tpu.dot_dimension_numbers<[1], [0], [0], [1], [0, 0, 1, 1], [], []>} : vector<8x32xf32>, vector<32x32xf32>, vector<8x32xf32> -> vector<8x32xf32>
    %82 = vector.shape_cast %80 : vector<8x32xf32> to vector<1x8x32xf32>
    %cst_27 = arith.constant dense<0.000000e+00> : vector<1x32xf32>
    %83 = vector.multi_reduction <add>, %82, %cst_27 [1] : vector<1x8x32xf32> to vector<1x32xf32>
    %84 = vector.shape_cast %83 : vector<1x32xf32> to vector<1x1x32xf32>
    %cst_28 = arith.constant 8.000000e+00 : f32
    %85 = vector.broadcast %cst_28 : f32 to vector<1x1x32xf32>
    %86 = arith.divf %84, %85 : vector<1x1x32xf32>
    %87 = arith.mulf %82, %82 : vector<1x8x32xf32>
    %cst_29 = arith.constant dense<0.000000e+00> : vector<1x32xf32>
    %88 = vector.multi_reduction <add>, %87, %cst_29 [1] : vector<1x8x32xf32> to vector<1x32xf32>
    %89 = vector.shape_cast %88 : vector<1x32xf32> to vector<1x1x32xf32>
    %cst_30 = arith.constant 8.000000e+00 : f32
    %90 = vector.broadcast %cst_30 : f32 to vector<1x1x32xf32>
    %91 = arith.divf %89, %90 : vector<1x1x32xf32>
    %92 = arith.mulf %86, %86 : vector<1x1x32xf32>
    %93 = arith.subf %91, %92 : vector<1x1x32xf32>
    %cst_31 = arith.constant 9.99999974E-6 : f32
    %94 = vector.broadcast %cst_31 : f32 to vector<1x1x32xf32>
    %95 = arith.addf %93, %94 : vector<1x1x32xf32>
    %96 = math.rsqrt %95 : vector<1x1x32xf32>
    %97 = arith.mulf %73, %96 : vector<1x1x32xf32>
    %98 = arith.mulf %97, %86 : vector<1x1x32xf32>
    %99 = arith.subf %75, %98 : vector<1x1x32xf32>
    %100 = vector.broadcast %97 : vector<1x1x32xf32> to vector<1x8x32xf32>
    %101 = arith.mulf %82, %100 : vector<1x8x32xf32>
    %102 = vector.broadcast %99 : vector<1x1x32xf32> to vector<1x8x32xf32>
    %103 = arith.addf %101, %102 : vector<1x8x32xf32>
    %104 = vector.shape_cast %103 : vector<1x8x32xf32> to vector<8x32xf32>
    %105 = vector.shape_cast %81 : vector<8x32xf32> to vector<1x8x32xf32>
    %cst_32 = arith.constant dense<0.000000e+00> : vector<1x32xf32>
    %106 = vector.multi_reduction <add>, %105, %cst_32 [1] : vector<1x8x32xf32> to vector<1x32xf32>
    %107 = vector.shape_cast %106 : vector<1x32xf32> to vector<1x1x32xf32>
    %cst_33 = arith.constant 8.000000e+00 : f32
    %108 = vector.broadcast %cst_33 : f32 to vector<1x1x32xf32>
    %109 = arith.divf %107, %108 : vector<1x1x32xf32>
    %110 = arith.mulf %105, %105 : vector<1x8x32xf32>
    %cst_34 = arith.constant dense<0.000000e+00> : vector<1x32xf32>
    %111 = vector.multi_reduction <add>, %110, %cst_34 [1] : vector<1x8x32xf32> to vector<1x32xf32>
    %112 = vector.shape_cast %111 : vector<1x32xf32> to vector<1x1x32xf32>
    %cst_35 = arith.constant 8.000000e+00 : f32
    %113 = vector.broadcast %cst_35 : f32 to vector<1x1x32xf32>
    %114 = arith.divf %112, %113 : vector<1x1x32xf32>
    %115 = arith.mulf %109, %109 : vector<1x1x32xf32>
    %116 = arith.subf %114, %115 : vector<1x1x32xf32>
    %cst_36 = arith.constant 9.99999974E-6 : f32
    %117 = vector.broadcast %cst_36 : f32 to vector<1x1x32xf32>
    %118 = arith.addf %116, %117 : vector<1x1x32xf32>
    %119 = math.rsqrt %118 : vector<1x1x32xf32>
    %120 = arith.mulf %77, %119 : vector<1x1x32xf32>
    %121 = arith.mulf %120, %109 : vector<1x1x32xf32>
    %122 = arith.subf %79, %121 : vector<1x1x32xf32>
    %123 = vector.broadcast %120 : vector<1x1x32xf32> to vector<1x8x32xf32>
    %124 = arith.mulf %105, %123 : vector<1x8x32xf32>
    %125 = vector.broadcast %122 : vector<1x1x32xf32> to vector<1x8x32xf32>
    %126 = arith.addf %124, %125 : vector<1x8x32xf32>
    %127 = vector.shape_cast %126 : vector<1x8x32xf32> to vector<8x32xf32>
    %128 = arith.negf %127 : vector<8x32xf32>
    %129 = math.exp %128 : vector<8x32xf32>
    %cst_37 = arith.constant 1.000000e+00 : f32
    %130 = vector.broadcast %cst_37 : f32 to vector<8x32xf32>
    %131 = arith.addf %130, %129 : vector<8x32xf32>
    %132 = arith.divf %130, %131 : vector<8x32xf32>
    %133 = arith.mulf %104, %132 : vector<8x32xf32>
    %134 = arith.addf %68, %133 : vector<8x32xf32>
    %cst_38 = arith.constant 0.707106769 : f32
    %135 = vector.broadcast %cst_38 : f32 to vector<8x32xf32>
    %136 = arith.mulf %134, %135 : vector<8x32xf32>
    %c0_39 = arith.constant 0 : index
    %c0_40 = arith.constant 0 : index
    %137 = vector.load %arg7[%c0_39, %c0_40] : memref<8x32xf32, #tpu.memory_space<vmem>>, vector<8x32xf32>
    tpu.vector_store %arg7[%c0_39, %c0_40], %136 {strides = array<i32>} : memref<8x32xf32, #tpu.memory_space<vmem>>, vector<8x32xf32>,
    return
  }
  func.func @transform_0(%arg0: i32) -> (i32, i32) {
    %c0_i32 = arith.constant 0 : i32
    %c0_i32_0 = arith.constant 0 : i32
    return %arg0, %c0_i32 : i32, i32
  }
  func.func @transform_1(%arg0: i32) -> (i32, i32) {
    %c0_i32 = arith.constant 0 : i32
    %c0_i32_0 = arith.constant 0 : i32
    %c0_i32_1 = arith.constant 0 : i32
    return %c0_i32, %c0_i32_0 : i32, i32
  }
  func.func @transform_2(%arg0: i32) -> (i32, i32) {
    %c0_i32 = arith.constant 0 : i32
    %c0_i32_0 = arith.constant 0 : i32
    %c0_i32_1 = arith.constant 0 : i32
    return %c0_i32, %c0_i32_0 : i32, i32
  }
  func.func @transform_3(%arg0: i32) -> (i32, i32) {
    %c0_i32 = arith.constant 0 : i32
    %c0_i32_0 = arith.constant 0 : i32
    %c0_i32_1 = arith.constant 0 : i32
    return %c0_i32, %c0_i32_0 : i32, i32
  }
  func.func @transform_4(%arg0: i32) -> (i32, i32) {
    %c0_i32 = arith.constant 0 : i32
    %c0_i32_0 = arith.constant 0 : i32
    %c0_i32_1 = arith.constant 0 : i32
    return %c0_i32, %c0_i32_0 : i32, i32
  }
  func.func @transform_5(%arg0: i32) -> (i32, i32) {
    %c0_i32 = arith.constant 0 : i32
    %c0_i32_0 = arith.constant 0 : i32
    %c0_i32_1 = arith.constant 0 : i32
    return %c0_i32, %c0_i32_0 : i32, i32
  }
  func.func @transform_6(%arg0: i32) -> (i32, i32) {
    %c0_i32 = arith.constant 0 : i32
    %c0_i32_0 = arith.constant 0 : i32
    return %arg0, %c0_i32 : i32, i32
  }
}

</mosaic_0001>

<bundles_post_ra>
// kernel: tpu_custom_call.1
= control target key start
LH: loop header
LB: loop body
LE: loop exit
PB: predicated region body
PF: predicated region fallthrough
CT: control target
= control target key end

     0   :  { %11 = vsyncpa [#allocation3], 0  ;;  %s1773_s0 = inlined_call_operand.hbm [shape: f32[16,32], index: 0, kind: input, shape index: {}]   ;;  %s1774_s1 = inlined_call_operand.hbm [shape: f32[32,32], index: 1, kind: input, shape index: {}]   ;;  %s1775_s2 = inlined_call_operand.hbm [shape: f32[32,32], index: 2, kind: input, shape index: {}]   ;;  %s1776_s3 = inlined_call_operand.hbm [shape: f32[32,32], index: 3, kind: input, shape index: {}]   ;;  %s1777_s4 = inlined_call_operand.hbm [shape: f32[32,32], index: 4, kind: input, shape index: {}]   ;;  %s1778_s5 = inlined_call_operand.vmem [shape: f32[8,32], index: 5, kind: input, shape index: {}]   ;;  %s1779_s6 = inlined_call_operand.hbm [shape: f32[16,32], index: 6, kind: output, shape index: {}]  }
   0x1   :  { %13 = vsyncpa [#allocation3 + $0x1], 0 }
   0x2   :  { %14 = vsyncpa [#allocation6], 0 }
   0x3   :  { %15 = vsyncpa [#allocation9], 0 }
   0x4   :  { %16 = vsyncpa [#allocation4], 0 }
   0x5   :  { %18 = vsyncpa [#allocation4 + $0x1], 0  ;;  %s1407_s21 = smov 0   ;;  %s1409_s22 = smov 0  }
   0x6   :  { %s1411_s23 = smov 0   ;;  %s1413_s24 = smov 0  }
   0x7 LB: > { %s1361_s25 = smov [#allocation5]   ;;  %s1428_s27 = sadd.s32 4294967295, %s1359_s24   ;;  %s1359_s24 = sphi %s1413_s24, %s1803_s24   ;;  %s1355_s23 = sphi %s1411_s23, %s1802_s23   ;;  %s1351_s22 = sphi %s1409_s22, %s1801_s22   ;;  %s1347_s21 = sphi %s1407_s21, %s1800_s21  }
   0x8   : > { %s198_s26 = sshll.u32 %s1361_s25, 4  ;;  %p922_p0 = scmp.ge.s32.totalorder %s1359_s24, 1  ;;  %s1433_s26 = int_to_ptr.vmem [resolvable:$true] %s198_s26 }
   0x9   : > { %p1780_p1 = scmp.eq.s32.totalorder %s1428_s27, 0  ;;  %p186_p2 = scmp.lt.s32.totalorder %s1359_s24, 3 }
   0xa   : > { %s1362_s29 = smov [#allocation8]   ;;  %s1363_s8 = smov [#allocation7]  }
   0xb   : > { %p1435_p3 = pnand %p922_p0, %p186_p2  ;;  %s224_s30 = sshll.u32 %s1362_s29, 4  ;;  %s1448_s30 = int_to_ptr.vmem [resolvable:$true] %s224_s30 }
   0xc   : > { %s211_s9 = sshll.u32 %s1363_s8, 4  ;;  %s1143_s12 = scalar_lea.hbm %s1774_s1, 512  ;;  %s1450_s9 = int_to_ptr.vmem [resolvable:$true] %s211_s9 }
   0xd   : > { %s1783_s28 = scalar_select %p1435_p3, 1, 0 }
   0xe   : > { %p1055_p5 = pneg %p1435_p3  ;;  %p1144_p7 = scmp.ne.s32.totalorder %s1774_s1, %s1143_s12 }
   0xf   : > { %p1150_p11 = scmp.lt.u32.totalorder %s1143_s12, %s1774_s1 }
  0x10   : > { %p1444_p6 = pnand %p1055_p5, %p1780_p1 }
  0x12   : > { %p1460_p8 = pneg %p1444_p6 }
  0x14   : > { %p1146_p9 = pnand %p1460_p8, %p1144_p7 }
  0x16   : > { %p1147_p10 = pneg %p1146_p9 }
  0x18   : > { %p1152_p12 = pnand %p1150_p11, %p1147_p10 }
  0x1a   : > { %1155 = shalt.err (!%p1152_p12)
}
  0x1b   : > { %s1156_s18 = scalar_lea.vmem %s1433_s26, 512  ;;  %p1164_p5 = scmp.lt.s32.totalorder %s1433_s26, %s1433_s26 }
  0x1c   : > { %p1157_p13 = scmp.ne.s32.totalorder %s1433_s26, %s1156_s18  ;;  %p1165_p4 = scmp.lt.s32.totalorder %s1156_s18, %s1156_s18 }
  0x1e   : > { %p1159_p0 = pnand %p1157_p13, %p1460_p8  ;;  %p1166_p7 = por %p1165_p4, %p1164_p5 }
  0x20   : > { %p1160_p2 = pneg %p1159_p0 }
  0x22   : > { %p1167_p9 = pnand %p1166_p7, %p1160_p2 }
  0x24   : > { %1170 = shalt.err (!%p1167_p9)
}
  0x25   : > { %s1364_s19 = smov 128   ;;  %s1365_s20 = smov 8  }
  0x26   : > { %1058 = dma.hbm_to_vmem [thread:$0]  (!%p1444_p6), %s1774_s1, 512, %s1433_s26, [#allocation6], %s1364_s19, %s1364_s19, %s1365_s20  }
  0x27   : > { %s1171_s11 = scalar_lea.hbm %s1776_s3, 512 }
  0x28   : > { %p1172_p4 = scmp.ne.s32.totalorder %s1776_s3, %s1171_s11  ;;  %p1178_p12 = scmp.lt.u32.totalorder %s1171_s11, %s1776_s3 }
  0x2a   : > { %p1174_p10 = pnand %p1172_p4, %p1460_p8 }
  0x2c   : > { %p1175_p11 = pneg %p1174_p10 }
  0x2e   : > { %p1180_p13 = pnand %p1178_p12, %p1175_p11 }
  0x30   : > { %1183 = shalt.err (!%p1180_p13)
}
  0x31   : > { %s1184_s26 = scalar_lea.vmem %s1448_s30, 512  ;;  %p1192_p7 = scmp.lt.s32.totalorder %s1448_s30, %s1448_s30 }
  0x32   : > { %p1185_p0 = scmp.ne.s32.totalorder %s1448_s30, %s1184_s26  ;;  %p1193_p9 = scmp.lt.s32.totalorder %s1184_s26, %s1184_s26 }
  0x34   : > { %p1187_p2 = pnand %p1185_p0, %p1460_p8  ;;  %p1194_p4 = por %p1193_p9, %p1192_p7 }
  0x36   : > { %p1188_p5 = pneg %p1187_p2 }
  0x38   : > { %p1195_p10 = pnand %p1194_p4, %p1188_p5 }
  0x3a   : > { %1198 = shalt.err (!%p1195_p10)
}
  0x3b   : > { %1064 = dma.hbm_to_vmem [thread:$0]  (!%p1444_p6), %s1776_s3, 512, %s1448_s30, [#allocation9], %s1364_s19, %s1364_s19, %s1365_s20  }
  0x3c   : > { %s1199_s8 = scalar_lea.hbm %s1775_s2, 512 }
  0x3d   : > { %p1200_p11 = scmp.ne.s32.totalorder %s1775_s2, %s1199_s8  ;;  %p1206_p0 = scmp.lt.u32.totalorder %s1199_s8, %s1775_s2 }
  0x3f   : > { %p1202_p12 = pnand %p1200_p11, %p1460_p8 }
  0x41   : > { %p1203_p13 = pneg %p1202_p12 }
  0x43   : > { %p1208_p2 = pnand %p1206_p0, %p1203_p13 }
  0x45   : > { %1211 = shalt.err (!%p1208_p2)
}
  0x46   : > { %s1212_s30 = scalar_lea.vmem %s1450_s9, 512  ;;  %p1220_p4 = scmp.lt.s32.totalorder %s1450_s9, %s1450_s9 }
  0x47   : > { %p1213_p5 = scmp.ne.s32.totalorder %s1450_s9, %s1212_s30  ;;  %p1221_p10 = scmp.lt.s32.totalorder %s1212_s30, %s1212_s30 }
  0x49   : > { %p1215_p7 = pnand %p1213_p5, %p1460_p8  ;;  %p1222_p11 = por %p1221_p10, %p1220_p4 }
  0x4b   : > { %p1216_p9 = pneg %p1215_p7 }
  0x4d   : > { %p1223_p12 = pnand %p1222_p11, %p1216_p9 }
  0x4f   : > { %1226 = shalt.err (!%p1223_p12)
}
  0x50   : > { %1061 = dma.hbm_to_vmem [thread:$0]  (!%p1444_p6), %s1775_s2, 512, %s1450_s9, [#allocation6], %s1364_s19, %s1364_s19, %s1365_s20  }
  0x51   : > { %s1366_s26 = smov [#allocation10]   ;;  %s1227_s29 = scalar_lea.hbm %s1777_s4, 512 }
  0x52   : > { %s237_s17 = sshll.u32 %s1366_s26, 4  ;;  %p1228_p13 = scmp.ne.s32.totalorder %s1777_s4, %s1227_s29  ;;  %s238_s17 = int_to_ptr.vmem [resolvable:$true] %s237_s17 }
  0x53   : > { %p1234_p5 = scmp.lt.u32.totalorder %s1227_s29, %s1777_s4 }
  0x54   : > { %p1230_p0 = pnand %p1228_p13, %p1460_p8 }
  0x56   : > { %p1231_p2 = pneg %p1230_p0 }
  0x58   : > { %p1236_p7 = pnand %p1234_p5, %p1231_p2 }
  0x5a   : > { %1239 = shalt.err (!%p1236_p7)
}
  0x5b   : > { %s1240_s9 = scalar_lea.vmem %s238_s17, 512  ;;  %p1248_p11 = scmp.lt.s32.totalorder %s238_s17, %s238_s17 }
  0x5c   : > { %p1241_p9 = scmp.ne.s32.totalorder %s238_s17, %s1240_s9  ;;  %p1249_p12 = scmp.lt.s32.totalorder %s1240_s9, %s1240_s9 }
  0x5e   : > { %p1243_p4 = pnand %p1241_p9, %p1460_p8  ;;  %p1250_p1 = por %p1249_p12, %p1248_p11 }
  0x60   : > { %p1244_p10 = pneg %p1243_p4 }
  0x62   : > { %p1251_p3 = pnand %p1250_p1, %p1244_p10 }
  0x64   : > { %1254 = shalt.err (!%p1251_p3)
}
  0x65   : > { %1067 = dma.hbm_to_vmem [thread:$0]  (!%p1444_p6), %s1777_s4, 512, %s238_s17, [#allocation9], %s1364_s19, %s1364_s19, %s1365_s20  }
  0x66   : > { %s921_s7 = sadd.s32 4294967294, %s1359_s24   ;;  %s1559_s15 = sadd.s32 1, %s1359_s24  }
  0x67   : > { %s28_s14 = ssub.s32 %s1359_s24, %s1559_s15  ;;  %s31_s16 = sadd.s32 1, %s1355_s23 }
  0x68   : > { %p29_p1 = scmp.eq.s32.totalorder %s28_s14, 0  ;;  %p38_p3 = scmp.ne.s32.totalorder %s1355_s23, %s1351_s22 }
  0x69   : > { %p39_p8 = scmp.eq.s32.totalorder %s1359_s24, 0  ;;  %p44_p13 = scmp.ne.s32.totalorder %s1351_s22, %s1347_s21 }
  0x6a   : > { %s1570_s26 = scalar_select %p29_p1, %s1355_s23, %s31_s16  }
  0x6b   : > { %p1572_p0 = por %p39_p8, %p38_p3  ;;  %p1787_p2 = scmp.eq.s32.totalorder %s1428_s27, 0 }
  0x6c   : > { %p173_p5 = scmp.eq.s32.totalorder %s1428_s27, 1  ;;  %p179_p7 = scmp.eq.s32.totalorder %s921_s7, 1 }
  0x6d   : > { %p1578_p6 = por %p1787_p2, %p44_p13  ;;  %p1080_p9 = scmp.lt.s32.totalorder %s1359_s24, 2 }
  0x6e   : > { %s254_s20 = sand.u32 1, %s1355_s23   ;;  %p1585_p4 = por %p173_p5, %p38_p3 }
  0x6f   : > { %p1589_p10 = por %p179_p7, %p44_p13  ;;  %s928_s29 = sshll.u32 %s254_s20, 3 }
  0x70   : > { %s1789_s17 = scalar_select %p1585_p4, 1, 0 }
  0x71   : > { %s1790_s25 = scalar_select %p1589_p10, 1, 0 }
  0x72   : > { %s929_s8 = sshll.u32 %s1359_s24, 7  ;;  %s258_s9 = scalar_lea.vmem [#allocation2], %s928_s29 }
  0x73   : > { %s1597_s12 = scalar_lea.hbm %s1773_s0, %s929_s8  ;;  %s265_s13 = sshll.u32 %s258_s9, 4  ;;  %s1599_s13 = int_to_ptr.vmem [resolvable:$true] %s265_s13 }
  0x74   : > { %p1603_p11 = pnand %p1080_p9, %p1572_p0  ;;  %s255_s7 = scalar_lea.sflag [#allocation3], %s254_s20 }
  0x75   : > { %s1255_s14 = scalar_lea.hbm %s1597_s12, 128  ;;  %s1260_s8 = scalar_lea.hbm %s1773_s0, 256 }
  0x76   : > { %p1256_p12 = scmp.ne.s32.totalorder %s1597_s12, %s1255_s14  ;;  %p1257_p1 = pneg %p1603_p11 }
  0x77   : > { %p1261_p13 = scmp.lt.u32.totalorder %s1597_s12, %s1773_s0  ;;  %p1262_p0 = scmp.lt.u32.totalorder %s1260_s8, %s1255_s14 }
  0x78   : > { %p1258_p3 = pnand %p1257_p1, %p1256_p12  ;;  %p1264_p5 = scmp.lt.u32.totalorder %s1255_s14, %s1597_s12 }
  0x79   : > { %p1263_p2 = por %p1262_p0, %p1261_p13 }
  0x7a   : > { %p1259_p8 = pneg %p1258_p3 }
  0x7b   : > { %p1265_p7 = por %p1264_p5, %p1263_p2 }
  0x7d   : > { %p1266_p9 = pnand %p1265_p7, %p1259_p8 }
  0x7f   : > { %1269 = shalt.err (!%p1266_p9)
}
  0x80   : > { %s1270_s20 = scalar_lea.vmem %s1599_s13, 128  ;;  %s1367_s11 = smov [#allocation2]  }
  0x81   : > { %p1271_p12 = scmp.ne.s32.totalorder %s1599_s13, %s1270_s20  ;;  %s1275_s9 = sshll.u32 %s1367_s11, 4  ;;  %s1276_s9 = int_to_ptr.vmem [resolvable:$false] %s1275_s9 }
  0x82   : > { %s1277_s16 = scalar_lea.vmem %s1276_s9, 256  ;;  %p1278_p4 = scmp.lt.s32.totalorder %s1599_s13, %s1276_s9 }
  0x83   : > { %p1273_p3 = pnand %p1271_p12, %p1257_p1  ;;  %p1279_p13 = scmp.lt.s32.totalorder %s1277_s16, %s1270_s20 }
  0x85   : > { %p1274_p10 = pneg %p1273_p3  ;;  %p1280_p0 = por %p1279_p13, %p1278_p4 }
  0x87   : > { %p1281_p2 = pnand %p1280_p0, %p1274_p10 }
  0x89   : > { %1284 = shalt.err (!%p1281_p2)
}
  0x8a   : > { %1071 = dma.hbm_to_vmem [thread:$0]  (!%p1603_p11), %s1597_s12, 128, %s1599_s13, %s255_s7  }
  0x8b   : > { %p1792_p8 = scmp.ne.s32.totalorder %s1783_s28, 0 }
  0x8c   : > { %s1635_s14 = sand.u32 (!%p1792_p8), 1, %s1351_s22  }
  0x8d   : > { %274 = sbr.rel (%p1792_p8) target bundleno = 756 (0x2f4), region = 44  ;;  %s931_s29 = sshll.u32 (!%p1792_p8), %s1635_s14, 3 }
  0x8e   : > { %s277_s8 = scalar_lea.sflag (!%p1792_p8), [#allocation3], %s1635_s14  ;;  %s1641_s18 = scalar_lea.vmem (!%p1792_p8), [#allocation2], %s931_s29 }
  0x94   : > { %1330 = dma.done.wait (%p1578_p6), %s277_s8, 128  }
  0x95   : > { %1332 = vsyncadd (%p1578_p6), %s277_s8, 4294967168  ;;  %p1793_p4 = scmp.eq.s32.totalorder %s1428_s27, 0 }
  0x97   : > { %1334 = dma.done.wait (%p1793_p4), [#allocation6], 1024   ;;  %p1794_p10 = pmov %p1793_p4 }
  0x98   : > { %p1795_p11 = pmov %p1793_p4 }
  0x99   : > { %1336 = vsyncadd (%p1794_p10), [#allocation6], 4294966272 }
  0x9a   : > { %1338 = dma.done.wait (%p1795_p11), [#allocation9], 1024   ;;  %p1796_p1 = pmov %p1793_p4 }
  0x9b   : > { %v1368_v0 = vmov 0.0|0.0   ;;  %vm1369_vm0 = vmmov 0   ;;  %v1370_v1 = vmov 0.0   ;;  %v326_v2 = vld [vmem:[#allocation5] sm:$0xff]  ;;  %v327_v3 = vld [vmem:[#allocation5 + $0x8] sm:$0xff]  ;;  %v328_v7 = vld [vmem:[#allocation5 + $0x10] sm:$0xff] }
  0x9c   : > { %1340 = vsyncadd (%p1796_p1), [#allocation9], 4294966272  ;;  %1011 = vmatprep.subr.bf16.mxu0 %v1368_v0  ;;  %1017 = vmatprep.subr.bf16.mxu1 %v1368_v0  ;;  %v330_v4 = vld [vmem:[#allocation8] sm:$0xff]  ;;  %v1012_v5 = vpack.c.bf16 %v327_v3, %v326_v2  ;;  %v331_v6 = vld [vmem:[#allocation8 + $0x8] sm:$0xff]  ;;  %vm335_vm1 = vcmask 261120   ;;  %s944_s30 = sshll.u32 %s1428_s27, 7 }
  0x9d   : > { %975 = vmatprep.mubr.msk.f32.mxu0 %vm1369_vm0, %v1370_v1  ;;  %986 = vmatprep.mubr.msk.f32.mxu1 %vm1369_vm0, %v1370_v1  ;;  %v329_v8 = vld [vmem:[#allocation5 + $0x18] sm:$0xff]  ;;  %v1018_v9 = vpack.c.bf16 %v331_v6, %v330_v4  ;;  %v332_v10 = vld [vmem:[#allocation8 + $0x10] sm:$0xff]  ;;  %v563_v15 = vld [vmem:[#allocation7] sm:$0xff]  ;;  %s324_s7 = scalar_lea.vmem [#allocation11], %s931_s29  ;;  %s1728_s9 = scalar_lea.hbm %s1779_s6, %s944_s30 }
  0x9e   : > { %v333_v11 = vld [vmem:[#allocation8 + $0x18] sm:$0xff]  ;;  %1013 = vmatpush3.bf16.msra.mxu0 %v1012_v5  ;;  %v1015_v12 = vpack.c.bf16 %v329_v8, %v328_v7  ;;  %v564_v16 = vld [vmem:[#allocation7 + $0x8] sm:$0xff]  ;;  %v567_v17 = vld [vmem:[#allocation10] sm:$0xff]  ;;  %v507_v5 = vlaneseq  ;;  %s813_s10 = sshll.u32 %s324_s7, 4  ;;  %s800_s16 = scalar_lea.sflag [#allocation4], %s1635_s14  ;;  %s1730_s10 = int_to_ptr.vmem [resolvable:$true] %s813_s10 }
  0x9f   : > { %1019 = vmatpush3.bf16.msra.mxu1 %v1018_v9  ;;  %1014 = vmatprep.subr.bf16.mxu0 %v1368_v0  ;;  %v1021_v13 = vpack.c.bf16 %v333_v11, %v332_v10  ;;  %v1658_v14 = vld [vmem:[%s1641_s18] sm:$0xff]  ;;  %v1024_v18 = vpack.c.bf16 %v564_v16, %v563_v15  ;;  %v568_v19 = vld [vmem:[#allocation10 + $0x8] sm:$0xff]  ;;  %s1285_s27 = scalar_lea.vmem %s1730_s10, 128  ;;  %p1797_p5 = scmp.ne.s32.totalorder %s1789_s17, 0 }
  0xa0   : > { %1020 = vmatprep.subr.bf16.mxu1 %v1368_v0  ;;  %v565_v20 = vld [vmem:[#allocation7 + $0x10] sm:$0xff]  ;;  %v566_v21 = vld [vmem:[#allocation7 + $0x18] sm:$0xff]  ;;  %v1030_v22 = vpack.c.bf16 %v568_v19, %v567_v17  ;;  %v1675_v7 = vshrl.u32 %v507_v5, 7  ;;  %p1286_p6 = scmp.ne.s32.totalorder %s1730_s10, %s1285_s27  ;;  %s1371_s29 = smov [#allocation11]  }
  0xa1   : > { %v569_v23 = vld [vmem:[#allocation10 + $0x10] sm:$0xff]  ;;  %v570_v24 = vld [vmem:[#allocation10 + $0x18] sm:$0xff]  ;;  %v1027_v25 = vpack.c.bf16 %v566_v21, %v565_v20  ;;  %s1289_s8 = sshll.u32 %s1371_s29, 4  ;;  %s1290_s8 = int_to_ptr.vmem [resolvable:$false] %s1289_s8 }
  0xa2   : > { %1016 = vmatpush3.bf16.msra.mxu0 %v1015_v12  ;;  %v1033_v26 = vpack.c.bf16 %v570_v24, %v569_v23  ;;  %v334_v8 = vld [vmem:[%s1778_s5] sm:$0xf]  ;;  %v546_v12 = vsub.s32 2, %v1675_v7  ;;  %v551_v17 = vsub.s32 3, %v1675_v7  ;;  %p1287_p7 = pnand %p1286_p6, %p1797_p5  ;;  %s1291_s18 = scalar_lea.vmem %s1290_s8, 256 }
  0xa3   : > { %1022 = vmatpush3.bf16.msra.mxu1 %v1021_v13  ;;  %1023 = vmatprep.subr.bf16.mxu0 %v1368_v0  ;;  %p1292_p12 = scmp.lt.s32.totalorder %s1730_s10, %s1290_s8  ;;  %p1293_p3 = scmp.lt.s32.totalorder %s1291_s18, %s1285_s27 }
  0xa4   : > { %1029 = vmatprep.subr.bf16.mxu1 %v1368_v0  ;;  %p1288_p9 = pneg %p1287_p7 }
  0xa5   : > { %976 = vmatmul.mubr.msk.f32.vlgmr.msra.gmra.mrb[0].mxu0 %vm335_vm1, %v1658_v14  ;;  %p1294_p13 = por %p1293_p3, %p1292_p12 }
  0xa6   : > { %987 = vmatmul.mubr.msk.f32.vlgmr.msra.gmra.mrb[0].mxu1 %vm335_vm1, %v1658_v14  ;;  %997 = vmatprep.mubr.msk.f32.mxu0 %vm1369_vm0, %v1370_v1 }
  0xa7   : > { %1008 = vmatprep.mubr.msk.f32.mxu1 %vm1369_vm0, %v1370_v1  ;;  %1025 = vmatpush3.bf16.msra.mxu0 %v1024_v18  ;;  %p1295_p0 = pnand %p1294_p13, %p1288_p9 }
  0xa8   : > { %1031 = vmatpush3.bf16.msra.mxu1 %v1030_v22  ;;  %1026 = vmatprep.subr.bf16.mxu0 %v1368_v0 }
  0xa9   : > { %1032 = vmatprep.subr.bf16.mxu1 %v1368_v0 }
  0xab   : > { %1028 = vmatpush3.bf16.msra.mxu0 %v1027_v25 }
  0xac   : > { %1034 = vmatpush3.bf16.msra.mxu1 %v1033_v26 }
 0x178   : > { %v1666_v27 = vpop.f32.mrb[0].mxu0 }
 0x179   : > { %v479_v28 = vsel %vm335_vm1, %v1666_v27, 0.0  ;;  %v488_v29 = vmul.f32 %v1666_v27, %v1666_v27  ;;  %v475_v30 = vpop.f32.mrb[0].mxu1  ;;  %v977_v31 = vpop.f32.mrb[1].mxu0 }
 0x17a   : > { %v480_v32 = vrot.slane %v479_v28, 4  ;;  %v517_v33 = vsel %vm335_vm1, %v475_v30, 0.0  ;;  %v525_v34 = vmul.f32 %v475_v30, %v475_v30  ;;  %v988_v35 = vpop.f32.mrb[1].mxu1  ;;  %v509_v31 = vsub.s32 0, %v1675_v7 }
 0x17b   : > { %v489_v36 = vsel %vm335_vm1, %v488_v29, 0.0  ;;  %v518_v37 = vrot.slane %v517_v33, 4 }
 0x17c   : > { %v481_v38 = vadd.f32 %v480_v32, %v479_v28  ;;  %v490_v39 = vrot.slane %v489_v36, 4  ;;  %v526_v40 = vsel %vm335_vm1, %v525_v34, 0.0 }
 0x17d   : > { %v519_v41 = vadd.f32 %v518_v37, %v517_v33  ;;  %v527_v42 = vrot.slane %v526_v40, 4  ;;  %v514_v33 = vsub.s32 1, %v1675_v7 }
 0x17e   : > { %v482_v43 = vrot.slane %v481_v38, 2  ;;  %v491_v44 = vadd.f32 %v490_v39, %v489_v36 }
 0x17f   : > { %v520_v45 = vrot.slane %v519_v41, 2  ;;  %v528_v46 = vadd.f32 %v527_v42, %v526_v40 }
 0x180   : > { %v483_v47 = vadd.f32 %v482_v43, %v481_v38  ;;  %v492_v48 = vrot.slane %v491_v44, 2 }
 0x181   : > { %v521_v49 = vadd.f32 %v520_v45, %v519_v41  ;;  %v529_v50 = vrot.slane %v528_v46, 2 }
 0x182   : > { %v484_v53 = vrot.slane %v483_v47, 1  ;;  %v493_v54 = vadd.f32 %v492_v48, %v491_v44 }
 0x183   : > { %v522_v51 = vrot.slane %v521_v49, 1  ;;  %v530_v52 = vadd.f32 %v529_v50, %v528_v46 }
 0x184   : > { %v485_v59 = vadd.f32 %v484_v53, %v483_v47  ;;  %v494_v60 = vrot.slane %v493_v54, 1 }
 0x185   : > { %v523_v55 = vadd.f32 %v522_v51, %v521_v49  ;;  %v531_v56 = vrot.slane %v530_v52, 1 }
 0x186   : > { %v487_v0 = vmul.f32 0.125, %v485_v59  ;;  %v495_v1 = vadd.f32 %v494_v60, %v493_v54 }
 0x187   : > { %v524_v57 = vmul.f32 0.125, %v523_v55  ;;  %v532_v58 = vadd.f32 %v531_v56, %v530_v52 }
 0x188   : > { %v496_v3 = vmul.f32 0.125, %v495_v1  ;;  %v497_v4 = vmul.f32 %v487_v0, %v487_v0 }
 0x189   : > { %v533_v61 = vmul.f32 0.125, %v532_v58  ;;  %v534_v62 = vmul.f32 %v524_v57, %v524_v57 }
 0x18a   : > { %v498_v6 = vsub.f32 %v496_v3, %v497_v4 }
 0x18b   : > { %v535_v63 = vsub.f32 %v533_v61, %v534_v62 }
 0x18c   : > { %v499_v10 = vadd.f32 1e-05, %v498_v6 }
 0x18d   : > { %v536_v2 = vadd.f32 1e-05, %v535_v63 }
 0x18f   : > { %1127 = vrsqrt.f32 %v536_v2 }
 0x190   : > { %1129 = vrsqrt.f32 %v499_v10 }
 0x199   : > { %v1128_v9 = vpop.eup %1127 }
 0x19a   : > { %v538_v11 = vmul.f32 %v1128_v9, %v334_v8  ;;  %v1130_v23 = vpop.eup %1129 }
 0x19b   : > { %v501_v24 = vmul.f32 %v1130_v23, %v334_v8 }
 0x19c   : > { %v539_v13 = vmul.f32 %v538_v11, %v524_v57  ;;  %v547_v16 = vrot.slane %v538_v11, %v546_v12 }
 0x19d   : > { %v502_v25 = vmul.f32 %v501_v24, %v487_v0 }
 0x19e   : > { %v541_v15 = vrot.slane %v539_v13, 7  ;;  %v548_v19 = vmul.f32 %v547_v16, %v475_v30  ;;  %v510_v30 = vrot.slane %v501_v24, %v509_v31 }
 0x19f   : > { %v504_v28 = vrot.slane %v502_v25, 7 }
 0x1a0   : > { %v543_v18 = vsub.f32 %v334_v8, %v541_v15  ;;  %v511_v35 = vmul.f32 %v510_v30, %v1666_v27 }
 0x1a1   : > { %v506_v32 = vsub.f32 %v334_v8, %v504_v28 }
 0x1a2   : > { %v552_v20 = vrot.slane %v543_v18, %v551_v17 }
 0x1a3   : > { %v515_v34 = vrot.slane %v506_v32, %v514_v33 }
 0x1a4   : > { %v553_v21 = vadd.f32 %v552_v20, %v548_v19 }
 0x1a5   : > { %v516_v36 = vadd.f32 %v515_v34, %v511_v35 }
 0x1a6   : > { %v939_v22 = vmul.f32 -1.442695, %v553_v21 }
 0x1a8   : > { %1131 = vpow2.f32 %v939_v22  ;;  %v571_v22 = vld [vmem:[%s1778_s5 + $0x4] sm:$0xf] }
 0x1b2   : > { %v1132_v26 = vpop.eup %1131 }
 0x1b3   : > { %v557_v29 = vadd.f32 1.0, %v1132_v26 }
 0x1b5   : > { %1133 = vrcp.f32 %v557_v29 }
 0x1bf   : > { %v1134_v37 = vpop.eup %1133 }
 0x1c0   : > { %v560_v38 = vmul.f32 %v1134_v37, %v516_v36 }
 0x1c2   : > { %v561_v39 = vadd.f32 %v560_v38, %v1658_v14 }
 0x1c4   : > { %v1694_v40 = vmul.f32 0.70710677, %v561_v39 }
 0x1c6   : > { %998 = vmatmul.mubr.msk.f32.vlgmr.msra.gmra.mrb[2].mxu0 %vm335_vm1, %v1694_v40  ;;  %1009 = vmatmul.mubr.msk.f32.vlgmr.msra.gmra.mrb[2].mxu1 %vm335_vm1, %v1694_v40 }
 0x299   : > { %v1700_v41 = vpop.f32.mrb[2].mxu0  ;;  %v711_v42 = vpop.f32.mrb[2].mxu1 }
 0x29a   : > { %v715_v43 = vsel %vm335_vm1, %v1700_v41, 0.0  ;;  %v723_v27 = vmul.f32 %v1700_v41, %v1700_v41  ;;  %v752_v44 = vsel %vm335_vm1, %v711_v42, 0.0  ;;  %v760_v14 = vmul.f32 %v711_v42, %v711_v42  ;;  %v999_v45 = vpop.f32.mrb[3].mxu0  ;;  %v1010_v46 = vpop.f32.mrb[3].mxu1 }
 0x29b   : > { %v716_v47 = vrot.slane %v715_v43, 4  ;;  %v753_v48 = vrot.slane %v752_v44, 4 }
 0x29c   : > { %v724_v49 = vsel %vm335_vm1, %v723_v27, 0.0  ;;  %v761_v50 = vsel %vm335_vm1, %v760_v14, 0.0 }
 0x29d   : > { %v717_v51 = vadd.f32 %v716_v47, %v715_v43  ;;  %v725_v52 = vrot.slane %v724_v49, 4  ;;  %v754_v53 = vadd.f32 %v753_v48, %v752_v44  ;;  %v762_v54 = vrot.slane %v761_v50, 4 }
 0x29f   : > { %v718_v55 = vrot.slane %v717_v51, 2  ;;  %v726_v56 = vadd.f32 %v725_v52, %v724_v49  ;;  %v755_v57 = vrot.slane %v754_v53, 2  ;;  %v763_v58 = vadd.f32 %v762_v54, %v761_v50 }
 0x2a1   : > { %v756_v59 = vadd.f32 %v755_v57, %v754_v53  ;;  %v764_v60 = vrot.slane %v763_v58, 2  ;;  %v719_v61 = vadd.f32 %v718_v55, %v717_v51  ;;  %v727_v62 = vrot.slane %v726_v56, 2 }
 0x2a3   : > { %v757_v63 = vrot.slane %v756_v59, 1  ;;  %v765_v0 = vadd.f32 %v764_v60, %v763_v58  ;;  %v720_v3 = vrot.slane %v719_v61, 1  ;;  %v728_v4 = vadd.f32 %v727_v62, %v726_v56 }
 0x2a5   : > { %v758_v1 = vadd.f32 %v757_v63, %v756_v59  ;;  %v766_v2 = vrot.slane %v765_v0, 1  ;;  %v721_v10 = vadd.f32 %v720_v3, %v719_v61  ;;  %v729_v11 = vrot.slane %v728_v4, 1 }
 0x2a7   : > { %v759_v5 = vmul.f32 0.125, %v758_v1  ;;  %v767_v6 = vadd.f32 %v766_v2, %v765_v0  ;;  %v722_v16 = vmul.f32 0.125, %v721_v10  ;;  %v730_v18 = vadd.f32 %v729_v11, %v728_v4 }
 0x2a9   : > { %v768_v8 = vmul.f32 0.125, %v767_v6  ;;  %v769_v9 = vmul.f32 %v759_v5, %v759_v5  ;;  %v731_v19 = vmul.f32 0.125, %v730_v18  ;;  %v732_v20 = vmul.f32 %v722_v16, %v722_v16 }
 0x2ab   : > { %v770_v13 = vsub.f32 %v768_v8, %v769_v9  ;;  %v733_v21 = vsub.f32 %v731_v19, %v732_v20 }
 0x2ad   : > { %v771_v15 = vadd.f32 1e-05, %v770_v13  ;;  %v734_v24 = vadd.f32 1e-05, %v733_v21 }
 0x2af   : > { %1135 = vrsqrt.f32 %v771_v15 }
 0x2b0   : > { %1137 = vrsqrt.f32 %v734_v24 }
 0x2b9   : > { %v1136_v23 = vpop.eup %1135 }
 0x2ba   : > { %v773_v25 = vmul.f32 %v1136_v23, %v571_v22  ;;  %v1138_v37 = vpop.eup %1137 }
 0x2bb   : > { %v736_v38 = vmul.f32 %v1138_v37, %v571_v22 }
 0x2bc   : > { %v774_v26 = vmul.f32 %v773_v25, %v759_v5  ;;  %v782_v29 = vrot.slane %v773_v25, %v546_v12 }
 0x2bd   : > { %v737_v39 = vmul.f32 %v736_v38, %v722_v16  ;;  %v745_v12 = vrot.slane %v736_v38, %v509_v31 }
 0x2be   : > { %v776_v28 = vrot.slane %v774_v26, 7  ;;  %v783_v30 = vmul.f32 %v782_v29, %v711_v42 }
 0x2bf   : > { %v739_v27 = vrot.slane %v737_v39, 7  ;;  %v746_v42 = vmul.f32 %v745_v12, %v1700_v41 }
 0x2c0   : > { %v778_v32 = vsub.f32 %v571_v22, %v776_v28 }
 0x2c1   : > { %v741_v14 = vsub.f32 %v571_v22, %v739_v27 }
 0x2c2   : > { %v787_v34 = vrot.slane %v778_v32, %v551_v17 }
 0x2c3   : > { %v750_v17 = vrot.slane %v741_v14, %v514_v33 }
 0x2c4   : > { %v788_v35 = vadd.f32 %v787_v34, %v783_v30 }
 0x2c5   : > { %v751_v45 = vadd.f32 %v750_v17, %v746_v42 }
 0x2c6   : > { %v942_v36 = vmul.f32 -1.442695, %v788_v35 }
 0x2c8   : > { %1139 = vpow2.f32 %v942_v36 }
 0x2d2   : > { %v1140_v43 = vpop.eup %1139 }
 0x2d3   : > { %v792_v44 = vadd.f32 1.0, %v1140_v43 }
 0x2d5   : > { %1141 = vrcp.f32 %v792_v44 }
 0x2df   : > { %v1142_v46 = vpop.eup %1141 }
 0x2e0   : > { %v795_v47 = vmul.f32 %v1142_v46, %v751_v45 }
 0x2e2   : > { %v796_v48 = vadd.f32 %v795_v47, %v1694_v40 }
 0x2e4   : > { %v797_v49 = vmul.f32 0.70710677, %v796_v48 }
 0x2e6   : > { %798 = vst.msk [vmem:[%s324_s7] sm:$0xff] %vm335_vm1, %v797_v49 }
 0x2e7   : > { %1298 = shalt.err (!%p1295_p0)
}
 0x2e8   : > { %s1299_s14 = scalar_lea.hbm %s1728_s9, 128  ;;  %s1303_s12 = scalar_lea.hbm %s1779_s6, 256 }
 0x2e9   : > { %p1300_p2 = scmp.ne.s32.totalorder %s1728_s9, %s1299_s14  ;;  %p1304_p10 = scmp.lt.u32.totalorder %s1728_s9, %s1779_s6 }
 0x2ea   : > { %p1305_p11 = scmp.lt.u32.totalorder %s1303_s12, %s1299_s14  ;;  %p1307_p6 = scmp.lt.u32.totalorder %s1299_s14, %s1728_s9 }
 0x2eb   : > { %p1301_p8 = pnand %p1300_p2, %p1797_p5 }
 0x2ec   : > { %p1306_p1 = por %p1305_p11, %p1304_p10 }
 0x2ed   : > { %p1302_p4 = pneg %p1301_p8 }
 0x2ee   : > { %p1308_p7 = por %p1307_p6, %p1306_p1 }
 0x2f0   : > { %p1309_p9 = pnand %p1308_p7, %p1302_p4 }
 0x2f2   : > { %1312 = shalt.err (!%p1309_p9)
}
 0x2f3   : > { %1053 = dma.vmem_to_hbm [thread:$0]  (%p1797_p5), %s1730_s10, 128, %s1728_s9, %s800_s16  }
 0x2f4 PF: > { %s825_s7 = sand.u32 1, %s1347_s21   ;;  %p1798_p12 = scmp.ne.s32.totalorder %s1790_s25, 0 }
 0x2f5   : > { %p1799_p3 = scmp.ge.s32.totalorder %s1359_s24, 2  ;;  %s826_s20 = scalar_lea.sflag [#allocation4], %s825_s7 }
 0x2f7   : > { %p1073_p13 = pnand %p1799_p3, %p1798_p12 }
 0x2f9   : > { %1342 = dma.done.wait (!%p1073_p13), %s826_s20, 128  }
 0x2fa   : > { %1344 = vsyncadd (!%p1073_p13), %s826_s20, 4294967168  ;;  %p21_p0 = scmp.ge.s32.totalorder %s1559_s15, 4   ;;  %s1800_s21 = smov %s1351_s22 }
 0x2fb   : > { %s1801_s22 = smov %s1355_s23  ;;  %s1802_s23 = smov %s1570_s26 }
 0x2fc   : > { %s1803_s24 = smov %s1559_s15  ;;  %23 = sbr.rel (!%p21_p0) target bundleno = 7 (0x7), region = 105 }
 0x303   :  { %831 = vsyncpa [#allocation3], 1 }
 0x304   :  { %833 = vsyncpa [#allocation3 + $0x1], 1 }
 0x305   :  { %834 = vsyncpa [#allocation6], 1 }
 0x306   :  { %835 = vsyncpa [#allocation9], 1 }
 0x307   :  { %836 = vsyncpa [#allocation4], 1 }
 0x308   :  { %838 = vsyncpa [#allocation4 + $0x1], 1 }

</bundles_post_ra>
